<compile_context>
chip_gen: v7x
topology: tpu7x:2x2x1
jax: 0.10.0
libtpu: 0.0.40
codegen_flags: <defaults>
</compile_context>

<pallas_src>
import jax
import jax.numpy as jnp
from jax.experimental import pallas as pl
from jax.experimental.pallas import tpu as pltpu

IN_FEATURES = 8
OUT_FEATURES = 10
OUT_PAD = 128  # lane-dense padded output width


def _linear_hardsig_kernel(x_ref, wb_ref, o_ref):
    # x_ref:  (B, IN)
    # wb_ref: (IN+1, OUT_PAD)  -- rows [0:IN] = W.T/6 (zero-padded), row [IN] = (b+3)/6
    # o_ref:  (B, OUT_PAD)
    w = wb_ref[:IN_FEATURES, :]          # static slice: (IN, OUT_PAD), no runtime cost
    b = wb_ref[IN_FEATURES:, :]          # static slice: (1, OUT_PAD)
    v = jnp.dot(x_ref[...], w, preferred_element_type=jnp.float32) + b
    o_ref[...] = jnp.clip(v, 0.0, 1.0).astype(o_ref.dtype)


def prepare_params(weight, bias):
    """One-time parameter fold: transpose, fold hard-sigmoid constants, stack W'|b',
    and zero-pad the output dimension to a lane-dense 128."""
    out_features, in_features = weight.shape
    w_folded = (weight / 6.0).T                                # (IN, OUT)
    b_folded = ((bias + 3.0) / 6.0).reshape(1, out_features)   # (1, OUT)
    wb = jnp.concatenate([w_folded, b_folded], axis=0)         # (IN+1, OUT)
    wb_padded = jnp.zeros((in_features + 1, OUT_PAD), jnp.float32)
    wb_padded = wb_padded.at[:, :out_features].set(wb)         # (IN+1, OUT_PAD)
    return wb_padded


def linear_hardsig(x, wb_padded):
    B = x.shape[0]
    out_padded = pl.pallas_call(
        _linear_hardsig_kernel,
        out_shape=jax.ShapeDtypeStruct((B, OUT_PAD), x.dtype),
        in_specs=[
            pl.BlockSpec(memory_space=pltpu.MemorySpace.VMEM),
            pl.BlockSpec(memory_space=pltpu.MemorySpace.VMEM),
        ],
        out_specs=pl.BlockSpec(memory_space=pltpu.MemorySpace.VMEM),
    )(x, wb_padded)
    # Slice the lane-dense padded output back to the public (B, 10) shape.
    return out_padded[:, :OUT_FEATURES]


def reference(x, weight, bias):
    v1 = x @ weight.T + bias
    v2 = v1 + 3.0
    v3 = jnp.clip(v2, 0.0, 6.0)
    return v3 / 6.0


if __name__ == "__main__":
    key = jax.random.PRNGKey(0)
    k_x, k_w, k_b = jax.random.split(key, 3)

    batch = 1

    # Deterministic "Linear(8, 10)" parameters (PyTorch-style uniform init bound).
    bound = 1.0 / jnp.sqrt(jnp.float32(IN_FEATURES))
    weight = jax.random.uniform(
        k_w, (OUT_FEATURES, IN_FEATURES), jnp.float32, -bound, bound
    )
    bias = jax.random.uniform(k_b, (OUT_FEATURES,), jnp.float32, -bound, bound)

    x1 = jax.random.normal(k_x, (batch, IN_FEATURES), jnp.float32)

    # One-time parameter fold (static Linear weights), then the Pallas call.
    wb_padded = prepare_params(weight, bias)
    out = linear_hardsig(x1, wb_padded)
    out = jax.block_until_ready(out)

    ref = reference(x1, weight, bias)
    assert out.shape == (batch, OUT_FEATURES)
    assert jnp.allclose(out, ref, atol=1e-5, rtol=1e-5)

    print("KERNEL_OK")
</pallas_src>

<mosaic_0001>
module attributes {stable_mosaic.version = 11 : i64} {
  func.func @_linear_hardsig_kernel(%arg0: memref<1x8xf32, #tpu.memory_space<vmem>>, %arg1: memref<9x128xf32, #tpu.memory_space<vmem>>, %arg2: memref<1x128xf32, #tpu.memory_space<vmem>>) attributes {dimension_semantics = [], scalar_prefetch = 0 : i64, scratch_operands = 0 : i64, tpu.core_type = #tpu.core_type<tc>} {
    %c0 = arith.constant 0 : index
    %c0_0 = arith.constant 0 : index
    %0 = vector.load %arg1[%c0, %c0_0] : memref<9x128xf32, #tpu.memory_space<vmem>>, vector<8x128xf32>
    %c8 = arith.constant 8 : index
    %c0_1 = arith.constant 0 : index
    %1 = vector.load %arg1[%c8, %c0_1] : memref<9x128xf32, #tpu.memory_space<vmem>>, vector<1x128xf32>
    %c0_2 = arith.constant 0 : index
    %c0_3 = arith.constant 0 : index
    %2 = vector.load %arg0[%c0_2, %c0_3] : memref<1x8xf32, #tpu.memory_space<vmem>>, vector<1x8xf32>
    %cst = arith.constant dense<0.000000e+00> : vector<1x128xf32>
    %3 = tpu.matmul %2, %0, %cst {dimension_numbers = #tpu.dot_dimension_numbers<[1], [0], [0], [1], [0, 0, 1, 1], [], []>} : vector<1x8xf32>, vector<8x128xf32>, vector<1x128xf32> -> vector<1x128xf32>
    %4 = arith.addf %3, %1 : vector<1x128xf32>
    %cst_4 = arith.constant 0.000000e+00 : f32
    %cst_5 = arith.constant 1.000000e+00 : f32
    %5 = vector.broadcast %cst_4 : f32 to vector<1x128xf32>
    %6 = arith.maximumf %5, %4 : vector<1x128xf32>
    %7 = vector.broadcast %cst_5 : f32 to vector<1x128xf32>
    %8 = arith.minimumf %7, %6 : vector<1x128xf32>
    %c0_6 = arith.constant 0 : index
    %c0_7 = arith.constant 0 : index
    %9 = vector.load %arg2[%c0_6, %c0_7] : memref<1x128xf32, #tpu.memory_space<vmem>>, vector<1x128xf32>
    tpu.vector_store %arg2[%c0_6, %c0_7], %8 {strides = array<i32>} : memref<1x128xf32, #tpu.memory_space<vmem>>, vector<1x128xf32>,
    return
  }
}

</mosaic_0001>

<bundles_post_ra>
// kernel: tpu_custom_call.1
= control target key start
LH: loop header
LB: loop body
LE: loop exit
PB: predicated region body
PF: predicated region fallthrough
CT: control target
= control target key end

     0   :  { %7 = vsyncpa [#allocation3], 0  ;;  %s286_s0 = inlined_call_operand.hbm [shape: f32[1,8], index: 0, kind: input, shape index: {}]   ;;  %s287_s1 = inlined_call_operand.hbm [shape: f32[9,128], index: 1, kind: input, shape index: {}]   ;;  %s288_s2 = inlined_call_operand.hbm [shape: f32[1,128], index: 2, kind: output, shape index: {}]  }
   0x1   :  { %8 = vsyncpa [#allocation6], 0 }
   0x2   :  { %9 = vsyncpa [#allocation4], 0  ;;  %s221_s9 = smov [#allocation2]   ;;  %s222_s11 = smov [#allocation5]  }
   0x3   :  { %s16_s10 = sshll.u32 %s221_s9, 4  ;;  %s25_s12 = sshll.u32 %s222_s11, 4  ;;  %s17_s10 = int_to_ptr.vmem [resolvable:$true] %s16_s10  ;;  %s243_s12 = int_to_ptr.vmem [resolvable:$true] %s25_s12 }
   0x4   :  { %s149_s15 = scalar_lea.hbm %s286_s0, 16 }
   0x5   :  { %p150_p0 = scmp.ne.s32.totalorder %s286_s0, %s149_s15  ;;  %p153_p1 = scmp.lt.u32.totalorder %s149_s15, %s286_s0 }
   0x7   :  { %p155_p2 = pnand %p153_p1, %p150_p0 }
   0x9   :  { %158 = shalt.err (!%p155_p2)
}
   0xa   :  { %s159_s20 = scalar_lea.vmem %s17_s10, 16  ;;  %s163_s21 = scalar_lea.vmem %s17_s10, 32 }
   0xb   :  { %p160_p3 = scmp.ne.s32.totalorder %s17_s10, %s159_s20  ;;  %p164_p4 = scmp.lt.s32.totalorder %s17_s10, %s17_s10 }
   0xc   :  { %p165_p5 = scmp.lt.s32.totalorder %s163_s21, %s159_s20 }
   0xe   :  { %p166_p6 = por %p165_p5, %p164_p4 }
  0x10   :  { %p167_p7 = pnand %p166_p6, %p160_p3 }
  0x12   :  { %170 = shalt.err (!%p167_p7)
}
  0x13   :  { %19 = dma.hbm_to_vmem [thread:$0]  %s286_s0, 16, %s17_s10, [#allocation3]  }
  0x14   :  { %s171_s26 = scalar_lea.hbm %s287_s1, 256 }
  0x15   :  { %p172_p8 = scmp.ne.s32.totalorder %s287_s1, %s171_s26  ;;  %p175_p9 = scmp.lt.u32.totalorder %s171_s26, %s287_s1 }
  0x17   :  { %p177_p10 = pnand %p175_p9, %p172_p8 }
  0x19   :  { %180 = shalt.err (!%p177_p10)
}
  0x1a   :  { %s181_s3 = scalar_lea.vmem %s243_s12, 256  ;;  %p186_p12 = scmp.lt.s32.totalorder %s243_s12, %s243_s12 }
  0x1b   :  { %p182_p11 = scmp.ne.s32.totalorder %s243_s12, %s181_s3  ;;  %p187_p13 = scmp.lt.s32.totalorder %s181_s3, %s181_s3 }
  0x1d   :  { %p188_p0 = por %p187_p13, %p186_p12 }
  0x1f   :  { %p189_p1 = pnand %p188_p0, %p182_p11 }
  0x21   :  { %192 = shalt.err (!%p189_p1)
}
  0x22   :  { %s223_s0 = smov 128   ;;  %s224_s4 = smov 8  }
  0x23   :  { %31 = dma.hbm_to_vmem [thread:$0]  %s287_s1, 256, %s243_s12, [#allocation6], %s223_s0, %s223_s0, %s224_s4  }
  0x24   :  { %215 = dma.done.wait [#allocation3], 16  }
  0x25   :  { %216 = vsyncadd [#allocation3], 4294967280 }
  0x26   :  { %217 = dma.done.wait [#allocation6], 256  }
  0x27   :  { %218 = vsyncadd [#allocation6], 4294967040  ;;  %v225_v0 = vmov 0.0   ;;  %vm226_vm0 = vmmov 0   ;;  %vm41_vm1 = vcmask 64512   ;;  %v38_v1 = vld [vmem:[#allocation5] sm:$0xff] }
  0x28   :  { %137 = vmatprep.subr.mxu0 %v225_v0  ;;  %139 = vmatprep.mubr.msk.f32.mxu0 %vm226_vm0, %v225_v0  ;;  %v40_v2 = vld [vmem:[#allocation2] sm:$0x1]  ;;  %v39_v3 = vld [vmem:[#allocation5 + $0x8] sm:$0x1]  ;;  %s227_s7 = smov [#allocation7]  }
  0x29   :  { %138 = vmatpush3.msra.mxu0 %v38_v1  ;;  %s124_s8 = sshll.u32 %s227_s7, 4  ;;  %s125_s8 = int_to_ptr.vmem [resolvable:$true] %s124_s8 }
  0x2a   :  { %140 = vmatmul.mubr.msk.f32.vlgmr.msra.gmra.mrb[0].mxu0 %vm41_vm1, %v40_v2  ;;  %s193_s1 = scalar_lea.vmem %s125_s8, 16  ;;  %s197_s9 = scalar_lea.vmem %s125_s8, 32 }
  0x2b   :  { %p194_p2 = scmp.ne.s32.totalorder %s125_s8, %s193_s1  ;;  %p198_p3 = scmp.lt.s32.totalorder %s125_s8, %s125_s8 }
  0x2c   :  { %p199_p4 = scmp.lt.s32.totalorder %s197_s9, %s193_s1 }
  0x2e   :  { %p200_p5 = por %p199_p4, %p198_p3 }
  0x30   :  { %p201_p6 = pnand %p200_p5, %p194_p2 }
  0xfd   :  { %v111_v4 = vpop.f32.mrb[0].mxu0 }
  0xfe   :  { %v112_v5 = vadd.f32 %v111_v4, %v39_v3  ;;  %v141_v6 = vpop.f32.mrb[1].mxu0 }
 0x100   :  { %v115_v7 = vmax.f32 %v112_v5, 0.0 }
 0x102   :  { %v116_v8 = vmin.f32 %v115_v7, 1.0 }
 0x104   :  { %117 = vst [vmem:[#allocation7] sm:$0x1] %v116_v8 }
 0x105   :  { %204 = shalt.err (!%p201_p6)
}
 0x106   :  { %s205_s12 = scalar_lea.hbm %s288_s2, 16 }
 0x107   :  { %p206_p7 = scmp.ne.s32.totalorder %s288_s2, %s205_s12  ;;  %p209_p8 = scmp.lt.u32.totalorder %s205_s12, %s288_s2 }
 0x109   :  { %p211_p9 = pnand %p209_p8, %p206_p7 }
 0x10b   :  { %214 = shalt.err (!%p211_p9)
}
 0x10c   :  { %127 = dma.vmem_to_hbm [thread:$0]  %s125_s8, 16, %s288_s2, [#allocation4]  }
 0x10d   :  { %219 = dma.done.wait [#allocation4], 16  }
 0x10e   :  { %220 = vsyncadd [#allocation4], 4294967280 }
 0x10f   :  { %131 = vsyncpa [#allocation3], 1 }
 0x110   :  { %132 = vsyncpa [#allocation6], 1 }
 0x111   :  { %133 = vsyncpa [#allocation4], 1 }

</bundles_post_ra>
